<compile_context>
chip_gen: v6e
topology: v6e:2x2x1
jax: 0.10.0
libtpu: 0.0.40
codegen_flags: <defaults>
</compile_context>

<pallas_src>
import functools

import jax
import jax.numpy as jnp
from jax.experimental import pallas as pl
from jax.experimental.pallas import tpu as pltpu


def _mlp_kernel(x_ref, w1_ref, b1_ref, w2_ref, b2_ref, w3_ref, b3_ref, o_ref):
    """Fused 3-layer MLP on one feature-major batch tile.

    x_ref: (3, TB) f32; w1: (128,3) bf16; w2: (64,128) bf16; w3: (1,64) f32;
    b*: (out, 1) f32; o_ref: (1, TB) f32.
    """
    # fc1: (128, 3) @ (3, TB) -> (128, TB); bf16 MXU, f32 accumulate.
    x = x_ref[...].astype(jnp.bfloat16)
    h1 = jnp.dot(w1_ref[...], x, preferred_element_type=jnp.float32)
    h1 = jnp.maximum(h1 + b1_ref[...], 0.0)          # bias/relu in f32 (v5e VPU)

    # fc2: (64, 128) @ (128, TB) -> (64, TB); dominant matmul, bf16 MXU.
    h2 = jnp.dot(w2_ref[...], h1.astype(jnp.bfloat16),
                 preferred_element_type=jnp.float32)
    h2 = jnp.maximum(h2 + b2_ref[...], 0.0)

    # fc3: (1, 64) @ (64, TB) -> (1, TB); tiny, f32, lane-dense output row.
    logit = jnp.dot(w3_ref[...], h2, preferred_element_type=jnp.float32)
    o_ref[...] = jax.nn.sigmoid(logit + b3_ref[...])


def _round_up(x, m):
    return ((x + m - 1) // m) * m


@functools.partial(jax.jit, static_argnames=("batch_tile",))
def color_memory_cnn_forward(x, params, *, batch_tile=8192):
    """x: (B, 3) float32. Returns (B, 1) float32, matching ColorMemoryCNN.forward."""
    w1, b1, w2, b2, w3, b3 = params
    B = x.shape[0]

    # Batch tile sits on the lane axis -> multiple of 128.  Cap it at
    # round_up(ceil(B/2), 128) so medium batches still produce >= 2 grid steps
    # (megacore sharding on v7x); tiny batches collapse to one 128-wide tile.
    half = -(-B // 2)
    tb = max(128, min(_round_up(batch_tile, 128), _round_up(half, 128)))
    grid = (pl.cdiv(B, tb),)

    # Feature-major input (batch on lanes).  No explicit padding: the final
    # partial tile is handled by Pallas (garbage columns never mix across the
    # batch axis and their outputs are dropped on writeback).
    x_t = x.T                                        # (3, B)

    # Weights pre-cast to bf16 for the MXU; biases stay f32.
    w1b = w1.astype(jnp.bfloat16)
    w2b = w2.astype(jnp.bfloat16)

    const = lambda i: (0, 0)   # resident weights/biases: fetched once.

    out = pl.pallas_call(
        _mlp_kernel,
        out_shape=jax.ShapeDtypeStruct((1, B), jnp.float32),
        grid=grid,
        in_specs=[
            pl.BlockSpec((3, tb), lambda i: (0, i)),   # x tile (feature-major)
            pl.BlockSpec((128, 3), const),             # w1 (bf16)
            pl.BlockSpec((128, 1), const),             # b1
            pl.BlockSpec((64, 128), const),            # w2 (bf16)
            pl.BlockSpec((64, 1), const),              # b2
            pl.BlockSpec((1, 64), const),              # w3
            pl.BlockSpec((1, 1), const),               # b3
        ],
        out_specs=pl.BlockSpec((1, tb), lambda i: (0, i)),
        compiler_params=pltpu.CompilerParams(
            dimension_semantics=("parallel",),
            vmem_limit_bytes=32 * 1024 * 1024),
    )(x_t, w1b, b1, w2b, b2, w3, b3)

    # (1, B) -> (B, 1): pure metadata reshape (same linear order).
    return out.reshape(B, 1)


def init_params(key):
    """Deterministic init mimicking nn.Linear's default U(-1/sqrt(fan_in), +1/sqrt(fan_in)).

    Weights stored PyTorch-style as (out, in); biases as (out, 1) so they
    broadcast over the lane (batch) axis inside the kernel.
    """
    dims = [(128, 3), (64, 128), (1, 64)]   # (fan_out, fan_in)
    params = []
    for fan_out, fan_in in dims:
        key, kw, kb = jax.random.split(key, 3)
        bound = 1.0 / float(fan_in) ** 0.5
        w = jax.random.uniform(kw, (fan_out, fan_in), jnp.float32, -bound, bound)
        b = jax.random.uniform(kb, (fan_out, 1), jnp.float32, -bound, bound)
        params += [w, b]
    return tuple(params)


def reference_forward(x, params):
    """Plain-JAX f32 reference (identical math to the PyTorch module)."""
    w1, b1, w2, b2, w3, b3 = params
    h1 = jnp.maximum(x @ w1.T + b1.T, 0.0)
    h2 = jnp.maximum(h1 @ w2.T + b2.T, 0.0)
    return jax.nn.sigmoid(h2 @ w3.T + b3.T)


if __name__ == "__main__":
    key = jax.random.PRNGKey(0)
    key, kx1, kx2 = jax.random.split(key, 3)
    params = init_params(key)

    # bf16 fc1/fc2 -> compare against the f32 reference at a bf16-appropriate
    # tolerance (outputs are sigmoid-squashed, so absolute error stays small).
    TOL = dict(atol=2e-2, rtol=2e-2)

    # Small batch: single 128-wide lane tile, partial block handling.
    x_small = jax.random.uniform(kx1, (16, 3), jnp.float32)
    out_small = jax.block_until_ready(color_memory_cnn_forward(x_small, params))
    ref_small = reference_forward(x_small, params)
    assert out_small.shape == (16, 1)
    assert jnp.allclose(out_small, ref_small, **TOL), "mismatch (small batch)"

    # Non-multiple batch: >= 2 grid steps (v7x megacore path) + partial tile.
    x_odd = jax.random.uniform(kx2, (300, 3), jnp.float32)
    out_odd = jax.block_until_ready(color_memory_cnn_forward(x_odd, params))
    ref_odd = reference_forward(x_odd, params)
    assert out_odd.shape == (300, 1)
    assert jnp.allclose(out_odd, ref_odd, **TOL), "mismatch (odd batch)"

    print("KERNEL_OK")
</pallas_src>

<mosaic_0001>
module attributes {stable_mosaic.version = 11 : i64} {
  func.func @_mlp_kernel(%arg0: i32, %arg1: memref<3x128xf32, #tpu.memory_space<vmem>>, %arg2: memref<128x3xbf16, #tpu.memory_space<vmem>>, %arg3: memref<128x1xf32, #tpu.memory_space<vmem>>, %arg4: memref<64x128xbf16, #tpu.memory_space<vmem>>, %arg5: memref<64x1xf32, #tpu.memory_space<vmem>>, %arg6: memref<1x64xf32, #tpu.memory_space<vmem>>, %arg7: memref<1x1xf32, #tpu.memory_space<vmem>>, %arg8: memref<1x128xf32, #tpu.memory_space<vmem>>) attributes {dimension_semantics = [#tpu.dimension_semantics<parallel>], iteration_bounds = array<i64: 1>, scalar_prefetch = 0 : i64, scratch_operands = 0 : i64, tpu.core_type = #tpu.core_type<tc>, window_params = [{transform_indices = @transform_0, window_bounds = array<i64: 3, 128>}, {pipeline_mode = #tpu.pipeline_mode<synchronous>, transform_indices = @transform_1, window_bounds = array<i64: 128, 3>}, {pipeline_mode = #tpu.pipeline_mode<synchronous>, transform_indices = @transform_2, window_bounds = array<i64: 128, 1>}, {pipeline_mode = #tpu.pipeline_mode<synchronous>, transform_indices = @transform_3, window_bounds = array<i64: 64, 128>}, {pipeline_mode = #tpu.pipeline_mode<synchronous>, transform_indices = @transform_4, window_bounds = array<i64: 64, 1>}, {pipeline_mode = #tpu.pipeline_mode<synchronous>, transform_indices = @transform_5, window_bounds = array<i64: 1, 64>}, {pipeline_mode = #tpu.pipeline_mode<synchronous>, transform_indices = @transform_6, window_bounds = array<i64: 1, 1>}, {transform_indices = @transform_7, window_bounds = array<i64: 1, 128>}]} {
    %c0 = arith.constant 0 : index
    %c0_0 = arith.constant 0 : index
    %0 = vector.load %arg1[%c0, %c0_0] : memref<3x128xf32, #tpu.memory_space<vmem>>, vector<3x128xf32>
    %1 = arith.truncf %0 : vector<3x128xf32> to vector<3x128xbf16>
    %c0_1 = arith.constant 0 : index
    %c0_2 = arith.constant 0 : index
    %2 = vector.load %arg2[%c0_1, %c0_2] : memref<128x3xbf16, #tpu.memory_space<vmem>>, vector<128x3xbf16>
    %cst = arith.constant dense<0.000000e+00> : vector<128x128xf32>
    %3 = tpu.matmul %2, %1, %cst {dimension_numbers = #tpu.dot_dimension_numbers<[1], [0], [0], [1], [0, 0, 1, 1], [], []>} : vector<128x3xbf16>, vector<3x128xbf16>, vector<128x128xf32> -> vector<128x128xf32>
    %c0_3 = arith.constant 0 : index
    %c0_4 = arith.constant 0 : index
    %4 = vector.load %arg3[%c0_3, %c0_4] : memref<128x1xf32, #tpu.memory_space<vmem>>, vector<128x1xf32>
    %5 = vector.broadcast %4 : vector<128x1xf32> to vector<128x128xf32>
    %6 = arith.addf %3, %5 : vector<128x128xf32>
    %cst_5 = arith.constant 0.000000e+00 : f32
    %7 = vector.broadcast %cst_5 : f32 to vector<128x128xf32>
    %8 = arith.maximumf %6, %7 : vector<128x128xf32>
    %c0_6 = arith.constant 0 : index
    %c0_7 = arith.constant 0 : index
    %9 = vector.load %arg4[%c0_6, %c0_7] : memref<64x128xbf16, #tpu.memory_space<vmem>>, vector<64x128xbf16>
    %10 = arith.truncf %8 : vector<128x128xf32> to vector<128x128xbf16>
    %cst_8 = arith.constant dense<0.000000e+00> : vector<64x128xf32>
    %11 = tpu.matmul %9, %10, %cst_8 {dimension_numbers = #tpu.dot_dimension_numbers<[1], [0], [0], [1], [0, 0, 1, 1], [], []>} : vector<64x128xbf16>, vector<128x128xbf16>, vector<64x128xf32> -> vector<64x128xf32>
    %c0_9 = arith.constant 0 : index
    %c0_10 = arith.constant 0 : index
    %12 = vector.load %arg5[%c0_9, %c0_10] : memref<64x1xf32, #tpu.memory_space<vmem>>, vector<64x1xf32>
    %13 = vector.broadcast %12 : vector<64x1xf32> to vector<64x128xf32>
    %14 = arith.addf %11, %13 : vector<64x128xf32>
    %cst_11 = arith.constant 0.000000e+00 : f32
    %15 = vector.broadcast %cst_11 : f32 to vector<64x128xf32>
    %16 = arith.maximumf %14, %15 : vector<64x128xf32>
    %c0_12 = arith.constant 0 : index
    %c0_13 = arith.constant 0 : index
    %17 = vector.load %arg6[%c0_12, %c0_13] : memref<1x64xf32, #tpu.memory_space<vmem>>, vector<1x64xf32>
    %cst_14 = arith.constant dense<0.000000e+00> : vector<1x128xf32>
    %18 = tpu.matmul %17, %16, %cst_14 {dimension_numbers = #tpu.dot_dimension_numbers<[1], [0], [0], [1], [0, 0, 1, 1], [], []>} : vector<1x64xf32>, vector<64x128xf32>, vector<1x128xf32> -> vector<1x128xf32>
    %c0_15 = arith.constant 0 : index
    %c0_16 = arith.constant 0 : index
    %19 = vector.load %arg7[%c0_15, %c0_16] : memref<1x1xf32, #tpu.memory_space<vmem>>, vector<1x1xf32>
    %20 = vector.broadcast %19 : vector<1x1xf32> to vector<1x128xf32>
    %21 = arith.addf %18, %20 : vector<1x128xf32>
    %22 = arith.negf %21 : vector<1x128xf32>
    %23 = math.exp %22 : vector<1x128xf32>
    %cst_17 = arith.constant 1.000000e+00 : f32
    %24 = vector.broadcast %cst_17 : f32 to vector<1x128xf32>
    %25 = arith.addf %24, %23 : vector<1x128xf32>
    %26 = arith.divf %24, %25 : vector<1x128xf32>
    %c0_18 = arith.constant 0 : index
    %c0_19 = arith.constant 0 : index
    %27 = vector.load %arg8[%c0_18, %c0_19] : memref<1x128xf32, #tpu.memory_space<vmem>>, vector<1x128xf32>
    tpu.vector_store %arg8[%c0_18, %c0_19], %26 {strides = array<i32>} : memref<1x128xf32, #tpu.memory_space<vmem>>, vector<1x128xf32>,
    return
  }
  func.func @transform_0(%arg0: i32) -> (i32, i32) {
    %c0_i32 = arith.constant 0 : i32
    %c0_i32_0 = arith.constant 0 : i32
    return %c0_i32, %arg0 : i32, i32
  }
  func.func @transform_1(%arg0: i32) -> (i32, i32) {
    %c0_i32 = arith.constant 0 : i32
    %c0_i32_0 = arith.constant 0 : i32
    %c0_i32_1 = arith.constant 0 : i32
    return %c0_i32, %c0_i32_0 : i32, i32
  }
  func.func @transform_2(%arg0: i32) -> (i32, i32) {
    %c0_i32 = arith.constant 0 : i32
    %c0_i32_0 = arith.constant 0 : i32
    %c0_i32_1 = arith.constant 0 : i32
    return %c0_i32, %c0_i32_0 : i32, i32
  }
  func.func @transform_3(%arg0: i32) -> (i32, i32) {
    %c0_i32 = arith.constant 0 : i32
    %c0_i32_0 = arith.constant 0 : i32
    %c0_i32_1 = arith.constant 0 : i32
    return %c0_i32, %c0_i32_0 : i32, i32
  }
  func.func @transform_4(%arg0: i32) -> (i32, i32) {
    %c0_i32 = arith.constant 0 : i32
    %c0_i32_0 = arith.constant 0 : i32
    %c0_i32_1 = arith.constant 0 : i32
    return %c0_i32, %c0_i32_0 : i32, i32
  }
  func.func @transform_5(%arg0: i32) -> (i32, i32) {
    %c0_i32 = arith.constant 0 : i32
    %c0_i32_0 = arith.constant 0 : i32
    %c0_i32_1 = arith.constant 0 : i32
    return %c0_i32, %c0_i32_0 : i32, i32
  }
  func.func @transform_6(%arg0: i32) -> (i32, i32) {
    %c0_i32 = arith.constant 0 : i32
    %c0_i32_0 = arith.constant 0 : i32
    %c0_i32_1 = arith.constant 0 : i32
    return %c0_i32, %c0_i32_0 : i32, i32
  }
  func.func @transform_7(%arg0: i32) -> (i32, i32) {
    %c0_i32 = arith.constant 0 : i32
    %c0_i32_0 = arith.constant 0 : i32
    return %c0_i32, %arg0 : i32, i32
  }
}

</mosaic_0001>

<bundles_post_ra>
// kernel: color_memory_cnn_forward.1
= control target key start
LH: loop header
LB: loop body
LE: loop exit
PB: predicated region body
PF: predicated region fallthrough
CT: control target
= control target key end

     0   :  { %s936_s0 = inlined_call_operand.vmem [shape: f32[3,16], index: 0, kind: input, shape index: {}]   ;;  %s937_s1 = inlined_call_operand.vmem [shape: bf16[128,3], index: 1, kind: input, shape index: {}]   ;;  %s938_s2 = inlined_call_operand.vmem [shape: f32[128,1], index: 2, kind: input, shape index: {}]   ;;  %s939_s3 = inlined_call_operand.vmem [shape: bf16[64,128], index: 3, kind: input, shape index: {}]   ;;  %s940_s4 = inlined_call_operand.vmem [shape: f32[64,1], index: 4, kind: input, shape index: {}]   ;;  %s941_s5 = inlined_call_operand.vmem [shape: f32[1,64], index: 5, kind: input, shape index: {}]   ;;  %s942_s6 = inlined_call_operand.<no memory space> [shape: f32[1,1], index: 6, kind: input, shape index: {}]   ;;  %s943_s7 = inlined_call_operand.hbm [shape: f32[1,16], index: 7, kind: output, shape index: {}]  }
   0x1   :  { %v12_v0 = vstv %s942_s6 }
   0x2   :  { %13 = vst [vmem:[#allocation2] sm:$0x1] %v12_v0 }
   0x3   :  { %v30_v1 = vld [vmem:[%s936_s0] sm:$0x7]  ;;  %vm209_vm0 = vcmask 1040384   ;;  %vm210_vm1 = vcmask 1041408   ;;  %v754_v4 = vmov 65535   ;;  %vm184_vm2 = vcmask 23552  }
   0x4   :  { %v716_v2 = vld [vmem:[%s937_s1] sm:$0xff]   ;;  %v31_v3 = vpack.c.bf16 %v30_v1, %v30_v1  ;;  %v211_v5 = vsel %vm209_vm0, 4294967295, %v754_v4  ;;  %v755_v8 = vmov 0   ;;  %v717_v9 = vld [vmem:[%s937_s1 + $0x8] sm:$0xff]   ;;  %v718_v10 = vld [vmem:[%s937_s1 + $0x10] sm:$0xff]  }
   0x5   :  { %v212_v6 = vsel %vm210_vm1, %v211_v5, 0  ;;  %650 = vmatprep.mubr.msk.bf16.mxu0 %vm184_vm2, %v716_v2  ;;  %714 = vset.pattern.permute.xlu0 %v755_v8  ;;  %v62_v11 = vld [vmem:[%s938_s2 + $0x70] sm:$0xff]  ;;  %v60_v12 = vld [vmem:[%s938_s2 + $0x60] sm:$0xff]  ;;  %v63_v13 = vld [vmem:[%s938_s2 + $0x78] sm:$0xff] }
   0x6   :  { %v214_v7 = vand.u32 %v212_v6, %v31_v3  ;;  %715 = vset.pattern.permute.xlu1 %v755_v8  ;;  %136 = vperm.xlu0 %714, %v62_v11   ;;  %v61_v14 = vld [vmem:[%s938_s2 + $0x68] sm:$0xff]  ;;  %v719_v15 = vld [vmem:[%s937_s1 + $0x18] sm:$0xff]   ;;  %v720_v16 = vld [vmem:[%s937_s1 + $0x20] sm:$0xff]  }
   0x7   :  { %126 = vperm.xlu1 %715, %v60_v12   ;;  %v58_v17 = vld [vmem:[%s938_s2 + $0x50] sm:$0xff]  ;;  %v59_v18 = vld [vmem:[%s938_s2 + $0x58] sm:$0xff]  ;;  %v56_v19 = vld [vmem:[%s938_s2 + $0x40] sm:$0xff] }
   0x8   :  { %648 = vmatprep.subr.bf16.mxu0 %v214_v7  ;;  %v57_v20 = vld [vmem:[%s938_s2 + $0x48] sm:$0xff] }
   0x9   :  { %649 = vmatpush3.bf16.msra.mxu0 %v214_v7 }
   0xa   :  { %141 = vperm.xlu0 %714, %v63_v13  }
   0xb   :  { %131 = vperm.xlu1 %715, %v61_v14  }
   0xc   :  { %651 = vmatmul.mubr.msk.bf16.vlgmr.msra.gmra.mxu0 %vm184_vm2, %v717_v9 }
   0xd   :  { %654 = vmatprep.mubr.msk.bf16.mxu0 %vm184_vm2, %v718_v10 }
   0xe   :  { %116 = vperm.xlu0 %714, %v58_v17  }
   0xf   :  { %121 = vperm.xlu1 %715, %v59_v18  }
  0x14   :  { %655 = vmatmul.mubr.msk.bf16.gmra.mxu0 %vm184_vm2, %v719_v15 }
  0x15   :  { %658 = vmatprep.mubr.msk.bf16.mxu0 %vm184_vm2, %v720_v16 }
  0x16   :  { %14 = vsyncpa [#allocation4], 0  ;;  %v721_v21 = vld [vmem:[%s937_s1 + $0x28] sm:$0xff]   ;;  %v722_v22 = vld [vmem:[%s937_s1 + $0x30] sm:$0xff]   ;;  %106 = vperm.xlu0 %714, %v56_v19   ;;  %111 = vperm.xlu1 %715, %v57_v20   ;;  %vm757_vm3 = vmmov 0   ;;  %vm501_vm4 = vcmask 523264  }
  0x17   :  { %v54_v23 = vld [vmem:[%s938_s2 + $0x30] sm:$0xff]  ;;  %v55_v24 = vld [vmem:[%s938_s2 + $0x38] sm:$0xff]  ;;  %v52_v25 = vld [vmem:[%s938_s2 + $0x20] sm:$0xff]  ;;  %s758_s23 = smov [#allocation3]  }
  0x18   :  { %v53_v26 = vld [vmem:[%s938_s2 + $0x28] sm:$0xff]  ;;  %v723_v27 = vld [vmem:[%s937_s1 + $0x38] sm:$0xff]   ;;  %v50_v28 = vld [vmem:[%s938_s2 + $0x10] sm:$0xff]  ;;  %s588_s24 = sshll.u32 %s758_s23, 4  ;;  %s589_s24 = int_to_ptr.vmem [resolvable:$true] %s588_s24 }
  0x19   :  { %v51_v29 = vld [vmem:[%s938_s2 + $0x18] sm:$0xff]  ;;  %v48_v30 = vld [vmem:[%s938_s2] sm:$0xff]  ;;  %v49_v31 = vld [vmem:[%s938_s2 + $0x8] sm:$0xff]  ;;  %s736_s1 = scalar_lea.vmem %s589_s24, 32  ;;  %p737_p1 = scmp.lt.s32.totalorder %s589_s24, %s589_s24 }
  0x1a   :  { %96 = vperm.xlu0 %714, %v54_v23   ;;  %101 = vperm.xlu1 %715, %v55_v24   ;;  %v352_v32 = vld [vmem:[%s940_s4 + $0x38] sm:$0xff]  ;;  %v351_v33 = vld [vmem:[%s940_s4 + $0x30] sm:$0xff]  ;;  %v350_v34 = vld [vmem:[%s940_s4 + $0x28] sm:$0xff] }
  0x1b   :  { %v349_v35 = vld [vmem:[%s940_s4 + $0x20] sm:$0xff]  ;;  %v348_v36 = vld [vmem:[%s940_s4 + $0x18] sm:$0xff]  ;;  %v347_v37 = vld [vmem:[%s940_s4 + $0x10] sm:$0xff] }
  0x1c   :  { %659 = vmatmul.mubr.msk.bf16.gmra.mxu0 %vm184_vm2, %v721_v21  ;;  %v346_v38 = vld [vmem:[%s940_s4 + $0x8] sm:$0xff]  ;;  %v345_v39 = vld [vmem:[%s940_s4] sm:$0xff] }
  0x1d   :  { %662 = vmatprep.mubr.msk.bf16.mxu0 %vm184_vm2, %v722_v22  ;;  %v491_v40 = vld [vmem:[#allocation2] sm:$0x1] }
  0x1e   :  { %86 = vperm.xlu0 %714, %v52_v25   ;;  %91 = vperm.xlu1 %715, %v53_v26   ;;  %v724_v41 = vld [vmem:[%s939_s3] sm:$0xff]  }
  0x1f   :  { %682 = vmatprep.mubr.bf16.mxu1 %v724_v41 }
  0x22   :  { %76 = vperm.xlu0 %714, %v50_v28   ;;  %81 = vperm.xlu1 %715, %v51_v29  }
  0x24   :  { %663 = vmatmul.mubr.msk.bf16.gmra.mxu0 %vm184_vm2, %v723_v27 }
  0x26   :  { %66 = vperm.xlu0 %714, %v48_v30   ;;  %71 = vperm.xlu1 %715, %v49_v31  }
  0x2a   :  { %390 = vperm.xlu0 %714, %v352_v32   ;;  %385 = vperm.xlu1 %715, %v351_v33  }
  0x2e   :  { %380 = vperm.xlu0 %714, %v350_v34   ;;  %375 = vperm.xlu1 %715, %v349_v35  }
  0x32   :  { %370 = vperm.xlu0 %714, %v348_v36   ;;  %365 = vperm.xlu1 %715, %v347_v37  }
  0x36   :  { %360 = vperm.xlu0 %714, %v346_v38   ;;  %355 = vperm.xlu1 %715, %v345_v39  }
  0x3a   :  { %494 = vperm.xlu0 %714, %v491_v40  }
  0x81   :  { %v137_v47 = vpop.permute.xlu0 %136 }
  0x82   :  { %v127_v45 = vpop.permute.xlu1 %126 }
  0x85   :  { %v142_v52 = vpop.permute.xlu0 %141 }
  0x86   :  { %v132_v50 = vpop.permute.xlu1 %131 }
  0x89   :  { %v117_v57 = vpop.permute.xlu0 %116 }
  0x8a   :  { %v122_v55 = vpop.permute.xlu1 %121 }
  0x91   :  { %v112_v60 = vpop.permute.xlu1 %111  ;;  %v107_v62 = vpop.permute.xlu0 %106 }
  0x95   :  { %v102_v4 = vpop.permute.xlu1 %101  ;;  %v97_v10 = vpop.permute.xlu0 %96 }
  0x99   :  { %v92_v18 = vpop.permute.xlu1 %91  ;;  %v87_v21 = vpop.permute.xlu0 %86 }
  0x9d   :  { %v82_v27 = vpop.permute.xlu1 %81  ;;  %v77_v31 = vpop.permute.xlu0 %76 }
  0xa1   :  { %v72_v37 = vpop.permute.xlu1 %71  ;;  %v67_v40 = vpop.permute.xlu0 %66 }
  0xcc   :  { %v912_v42 = vpop.f32.mrf.mxu0 }
  0xcd   :  { %v259_v38 = vadd.f32 %v912_v42, %v77_v31  ;;  %v725_v42 = vld [vmem:[%s939_s3 + $0x8] sm:$0xff]  }
  0xce   :  { %v914_v43 = vpop.f32.mrf.mxu0 }
  0xd0   :  { %v653_v44 = vpop.f32.mrf.mxu0 }
  0xd1   :  { %v262_v34 = vadd.f32 %v653_v44, %v82_v27 }
  0xd2   :  { %v916_v46 = vpop.f32.mrf.mxu0 }
  0xd3   :  { %v316_v41 = vmax.f32 %v262_v34, 0.0 }
  0xd4   :  { %v656_v48 = vpop.f32.mrf.mxu0 }
  0xd5   :  { %v275_v25 = vadd.f32 %v656_v48, %v97_v10  ;;  %v315_v48 = vmax.f32 %v259_v38, 0.0 }
  0xd6   :  { %v266_v49 = vpop.f32.mrf.mxu0 }
  0xd7   :  { %v319_v32 = vmax.f32 %v275_v25, 0.0  ;;  %v267_v33 = vadd.f32 %v266_v49, %v87_v21  ;;  %v338_v49 = vpack.c.bf16 %v316_v41, %v315_v48 }
  0xd8   :  { %v657_v51 = vpop.f32.mrf.mxu0 }
  0xd9   :  { %v278_v22 = vadd.f32 %v657_v51, %v102_v4  ;;  %v317_v39 = vmax.f32 %v267_v33, 0.0 }
  0xda   :  { %v269_v53 = vpop.f32.mrf.mxu0 }
  0xdb   :  { %v320_v28 = vmax.f32 %v278_v22, 0.0  ;;  %v270_v29 = vadd.f32 %v269_v53, %v92_v18  ;;  %v756_v53 = vmov 0.0   ;;  %v490_v22 = vld [vmem:[%s941_s5] sm:$0x1]  ;;  %s732_s5 = scalar_lea.vmem %s589_s24, 16 }
  0xdc   :  { %v660_v54 = vpop.f32.mrf.mxu0  ;;  %690 = vmatprep.subr.mxu0 %v756_v53  ;;  %706 = vmatprep.mubr.msk.f32.mxu0 %vm757_vm3, %v756_v53  ;;  %p733_p0 = scmp.ne.s32.totalorder %s589_s24, %s732_s5  ;;  %p738_p2 = scmp.lt.s32.totalorder %s736_s1, %s732_s5 }
  0xdd   :  { %v291_v11 = vadd.f32 %v660_v54, %v117_v57  ;;  %v340_v35 = vpack.c.bf16 %v320_v28, %v319_v32  ;;  %v318_v36 = vmax.f32 %v270_v29, 0.0 }
  0xde   :  { %v282_v56 = vpop.f32.mrf.mxu0  ;;  %p739_p3 = por %p738_p2, %p737_p1 }
  0xdf   :  { %v323_v19 = vmax.f32 %v291_v11, 0.0  ;;  %v283_v20 = vadd.f32 %v282_v56, %v107_v62  ;;  %v391_v56 = vpop.permute.xlu0 %390 }
  0xe0   :  { %v661_v58 = vpop.f32.mrf.mxu0  ;;  %p740_p4 = pnand %p739_p3, %p733_p0 }
  0xe1   :  { %v294_v6 = vadd.f32 %v661_v58, %v122_v55  ;;  %v321_v26 = vmax.f32 %v283_v20, 0.0  ;;  %v386_v58 = vpop.permute.xlu1 %385 }
  0xe2   :  { %v285_v59 = vpop.f32.mrf.mxu0 }
  0xe3   :  { %v324_v15 = vmax.f32 %v294_v6, 0.0  ;;  %v286_v16 = vadd.f32 %v285_v59, %v112_v60 }
  0xe4   :  { %v664_v61 = vpop.f32.mrf.mxu0 }
  0xe5   :  { %v307_v0 = vadd.f32 %v664_v61, %v137_v47  ;;  %v342_v23 = vpack.c.bf16 %v324_v15, %v323_v19  ;;  %v322_v24 = vmax.f32 %v286_v16, 0.0  ;;  %v339_v47 = vpack.c.bf16 %v318_v36, %v317_v39  ;;  %v381_v61 = vpop.permute.xlu0 %380 }
  0xe6   :  { %v298_v63 = vpop.f32.mrf.mxu0 }
  0xe7   :  { %v299_v2 = vadd.f32 %v298_v63, %v127_v45  ;;  %v327_v7 = vmax.f32 %v307_v0, 0.0  ;;  %v341_v30 = vpack.c.bf16 %v322_v24, %v321_v26  ;;  %v254_v45 = vadd.f32 %v916_v46, %v72_v37  ;;  %v726_v46 = vld [vmem:[%s939_s3 + $0x10] sm:$0xff]   ;;  %v376_v63 = vpop.permute.xlu1 %375 }
  0xe8   :  { %v665_v1 = vpop.f32.mrf.mxu0 }
  0xe9   :  { %v310_v3 = vadd.f32 %v665_v1, %v142_v52  ;;  %v325_v12 = vmax.f32 %v299_v2, 0.0  ;;  %v314_v44 = vmax.f32 %v254_v45, 0.0  ;;  %v371_v6 = vpop.permute.xlu0 %370 }
  0xea   :  { %v301_v5 = vpop.f32.mrf.mxu0 }
  0xeb   :  { %v328_v8 = vmax.f32 %v310_v3, 0.0  ;;  %v302_v9 = vadd.f32 %v301_v5, %v132_v50  ;;  %v251_v50 = vadd.f32 %v914_v43, %v67_v40  ;;  %v727_v43 = vld [vmem:[%s939_s3 + $0x18] sm:$0xff]  }
  0xed   :  { %v326_v13 = vmax.f32 %v302_v9, 0.0  ;;  %v344_v14 = vpack.c.bf16 %v328_v8, %v327_v7  ;;  %v313_v51 = vmax.f32 %v251_v50, 0.0  ;;  %v366_v9 = vpop.permute.xlu1 %365 }
  0xef   :  { %v343_v17 = vpack.c.bf16 %v326_v13, %v325_v12  ;;  %666 = vmatprep.subr.bf16.mxu1 %v344_v14  ;;  %v337_v52 = vpack.c.bf16 %v314_v44, %v313_v51 }
  0xf0   :  { %667 = vmatpush3.bf16.msra.mxu1 %v344_v14  ;;  %v361_v14 = vpop.permute.xlu0 %360 }
  0xf1   :  { %668 = vmatprep.subr.bf16.mxu1 %v343_v17 }
  0xf4   :  { %669 = vmatpush3.bf16.msra.mxu1 %v343_v17  ;;  %v356_v17 = vpop.permute.xlu1 %355  ;;  %v495_v26 = vpop.permute.xlu0 %494 }
  0xf5   :  { %670 = vmatprep.subr.bf16.mxu1 %v342_v23 }
  0xf8   :  { %671 = vmatpush3.bf16.msra.mxu1 %v342_v23  ;;  %v497_v23 = vlaneseq }
  0xf9   :  { %672 = vmatprep.subr.bf16.mxu1 %v341_v30 }
  0xfa   :  { %v498_v24 = vshrl.u32 %v497_v23, 7 }
  0xfc   :  { %673 = vmatpush3.bf16.msra.mxu1 %v341_v30  ;;  %v499_v25 = vsub.s32 0, %v498_v24 }
  0xfd   :  { %674 = vmatprep.subr.bf16.mxu1 %v340_v35 }
  0xfe   :  { %v500_v27 = vrot.slane %v495_v26, %v499_v25 }
 0x100   :  { %675 = vmatpush3.bf16.msra.mxu1 %v340_v35 }
 0x101   :  { %676 = vmatprep.subr.bf16.mxu1 %v339_v47 }
 0x104   :  { %677 = vmatpush3.bf16.msra.mxu1 %v339_v47 }
 0x105   :  { %678 = vmatprep.subr.bf16.mxu1 %v338_v49 }
 0x108   :  { %679 = vmatpush3.bf16.msra.mxu1 %v338_v49 }
 0x109   :  { %680 = vmatprep.subr.bf16.mxu1 %v337_v52 }
 0x10c   :  { %681 = vmatpush3.bf16.msra.mxu1 %v337_v52 }
 0x10f   :  { %683 = vmatmul.mubr.bf16.vlgmr.msra.gmra.mxu1 %v725_v42 }
 0x110   :  { %686 = vmatprep.mubr.bf16.mxu1 %v726_v46 }
 0x117   :  { %687 = vmatmul.mubr.bf16.gmra.mxu1 %v727_v43 }
 0x1cf   :  { %v684_v54 = vpop.f32.mrf.mxu1 }
 0x1d0   :  { %v460_v12 = vadd.f32 %v684_v54, %v366_v9 }
 0x1d1   :  { %v451_v55 = vpop.f32.mrf.mxu1 }
 0x1d2   :  { %v484_v18 = vmax.f32 %v460_v12, 0.0  ;;  %v452_v19 = vadd.f32 %v451_v55, %v356_v17 }
 0x1d3   :  { %v685_v57 = vpop.f32.mrf.mxu1 }
 0x1d4   :  { %v463_v10 = vadd.f32 %v685_v57, %v371_v6  ;;  %v482_v21 = vmax.f32 %v452_v19, 0.0 }
 0x1d5   :  { %v454_v59 = vpop.f32.mrf.mxu1 }
 0x1d6   :  { %v485_v15 = vmax.f32 %v463_v10, 0.0  ;;  %v455_v16 = vadd.f32 %v454_v59, %v361_v14 }
 0x1d7   :  { %v688_v60 = vpop.f32.mrf.mxu1 }
 0x1d8   :  { %v476_v1 = vadd.f32 %v688_v60, %v386_v58  ;;  %v483_v20 = vmax.f32 %v455_v16, 0.0 }
 0x1d9   :  { %v467_v62 = vpop.f32.mrf.mxu1 }
 0x1da   :  { %v488_v7 = vmax.f32 %v476_v1, 0.0  ;;  %v468_v8 = vadd.f32 %v467_v62, %v376_v63 }
 0x1db   :  { %v689_v0 = vpop.f32.mrf.mxu1 }
 0x1dc   :  { %v479_v2 = vadd.f32 %v689_v0, %v391_v56  ;;  %v486_v13 = vmax.f32 %v468_v8, 0.0 }
 0x1dd   :  { %v470_v3 = vpop.f32.mrf.mxu1 }
 0x1de   :  { %v489_v4 = vmax.f32 %v479_v2, 0.0  ;;  %v471_v5 = vadd.f32 %v470_v3, %v381_v61 }
 0x1e0   :  { %691 = vmatpush3.msra.mxu0 %v489_v4  ;;  %v487_v11 = vmax.f32 %v471_v5, 0.0 }
 0x1e1   :  { %692 = vmatprep.subr.mxu0 %v756_v53 }
 0x1e2   :  { %693 = vmatpush3.msra.mxu0 %v488_v7 }
 0x1e3   :  { %694 = vmatprep.subr.mxu0 %v756_v53 }
 0x1e4   :  { %695 = vmatpush3.msra.mxu0 %v487_v11 }
 0x1e5   :  { %696 = vmatprep.subr.mxu0 %v756_v53 }
 0x1e6   :  { %697 = vmatpush3.msra.mxu0 %v486_v13 }
 0x1e7   :  { %698 = vmatprep.subr.mxu0 %v756_v53 }
 0x1e8   :  { %699 = vmatpush3.msra.mxu0 %v485_v15 }
 0x1e9   :  { %700 = vmatprep.subr.mxu0 %v756_v53 }
 0x1ea   :  { %701 = vmatpush3.msra.mxu0 %v484_v18 }
 0x1eb   :  { %702 = vmatprep.subr.mxu0 %v756_v53 }
 0x1ec   :  { %703 = vmatpush3.msra.mxu0 %v483_v20 }
 0x1ed   :  { %704 = vmatprep.subr.mxu0 %v756_v53 }
 0x1ee   :  { %705 = vmatpush3.msra.mxu0 %v482_v21 }
 0x1ef   :  { %707 = vmatmul.mubr.msk.f32.vlgmr.msra.gmra.mxu0 %vm501_vm4, %v490_v22 }
 0x2af   :  { %v571_v28 = vpop.f32.mrf.mxu0 }
 0x2b0   :  { %v572_v29 = vadd.f32 %v571_v28, %v500_v27 }
 0x2b1   :  { %v708_v30 = vpop.f32.mrf.mxu0 }
 0x2b2   :  { %v617_v31 = vmul.f32 -1.442695, %v572_v29 }
 0x2b4   :  { %728 = vpow2.f32 %v617_v31 }
 0x2c1   :  { %v729_v32 = vpop.eup %728 }
 0x2c2   :  { %v578_v33 = vadd.f32 1.0, %v729_v32 }
 0x2c4   :  { %730 = vrcp.f32 %v578_v33 }
 0x2d1   :  { %v731_v34 = vpop.eup %730 }
 0x2d2   :  { %581 = vst [vmem:[#allocation3] sm:$0x1] %v731_v34 }
 0x2d3   :  { %743 = shalt.err (!%p740_p4)
}
 0x2d4   :  { %591 = dma.vmem_to_hbm [thread:$0]  %s589_s24, 16, %s943_s7, [#allocation4]  }
 0x2d5   :  { %752 = dma.done.wait [#allocation4], 16  }
 0x2d6   :  { %753 = vsyncadd [#allocation4], 4294967280 }
 0x2d7   :  { %595 = vsyncpa [#allocation4], 1 }

</bundles_post_ra>
